<compile_context>
chip_gen: v5e
topology: v5e:2x2
jax: 0.10.0
libtpu: 0.0.40
codegen_flags: <defaults>
</compile_context>

<pallas_src>
import functools

import jax
import jax.numpy as jnp
from jax.experimental import pallas as pl
from jax.experimental.pallas import tpu as pltpu


def _vmem_full(shape):
    # Whole-array block (no grid): block_shape == full array dims is always legal.
    return pl.BlockSpec(shape, lambda: (0,) * len(shape))


_SMEM_SPEC = pl.BlockSpec(memory_space=pltpu.MemorySpace.SMEM)


# ----------------------------- fused kernel ---------------------------------

def _sdcn_fused_kernel(
    conv_ref,                 # SMEM f32 (V+1,)  = [w_0 .. w_{V-1}, bias]
    x_ref,                    # VMEM f32 (V, N, L)
    adj_ref,                  # VMEM bf16 (N, N)
    w_ref,                    # VMEM bf16 (13, MAX_IN, MAX_OUT) packed weights
    b_ref,                    # VMEM f32  (9, MAX_B)            packed biases
    out_ref,                  # VMEM f32  (N, P) lane-dense packed output
    *, sigma, layer_dims, n_input, n_z, n_clusters, p_out,
):
    f32 = jnp.float32
    bf16 = jnp.bfloat16

    # ---- conv0: Conv1d(V->1, kernel_size=1) == per-channel weighted sum (VPU) ----
    # x is (V, N, L): leading-axis channel index -> clean full-vreg FMAs.
    V = x_ref.shape[0]
    pro = conv_ref[V] + conv_ref[0] * x_ref[0]          # (N, L) f32
    for v in range(1, V):                                # unrolled FMAs
        pro = pro + conv_ref[v] * x_ref[v]

    adj_bf = adj_ref[...]                                # already bf16 (wrapper pre-cast)

    def w_at(i):
        din, dout = layer_dims[i]
        return w_ref[i, :din, :dout]                     # bf16 (din, dout)

    def b_at(i, dout):
        return b_ref[i:i + 1, :dout]                     # f32 (1, dout)

    def dense(a, wi, bi, relu):
        _, dout = layer_dims[wi]
        y = jnp.dot(a.astype(bf16), w_at(wi),
                    preferred_element_type=f32) + b_at(bi, dout)
        return jnp.maximum(y, 0.0) if relu else y

    def gnn(a, wi, relu):
        din, dout = layer_dims[wi]
        a_bf = a.astype(bf16)
        if dout > din:
            # (adj @ a) @ W : N^2-sized matmul uses the smaller inner dim (din)
            t = jnp.dot(adj_bf, a_bf, preferred_element_type=f32)
            y = jnp.dot(t.astype(bf16), w_at(wi), preferred_element_type=f32)
        else:
            # adj @ (a @ W) : N^2-sized matmul uses dout (smaller or equal)
            t = jnp.dot(a_bf, w_at(wi), preferred_element_type=f32)
            y = jnp.dot(adj_bf, t.astype(bf16), preferred_element_type=f32)
        return jnp.maximum(y, 0.0) if relu else y

    # Packed-slab layer indices (must match wrapper packing order).
    (ENC1, ENC2, ENC3, ZL, DEC1, DEC2, DEC3, XBAR,
     GNN1, GNN2, GNN3, GNN4, FC) = range(13)
    # Bias slab rows: enc1..xbar -> 0..7, fc -> 8.

    # ---- AE encoder / decoder (Dropout -> identity in eval mode) ----
    tra1 = dense(pro, ENC1, 0, True)
    tra2 = dense(tra1, ENC2, 1, True)
    tra3 = dense(tra2, ENC3, 2, True)
    z = dense(tra3, ZL, 3, False)
    d1 = dense(z, DEC1, 4, True)
    d2 = dense(d1, DEC2, 5, True)
    d3 = dense(d2, DEC3, 6, True)
    x_bar = dense(d3, XBAR, 7, False)

    # ---- GCN branch with sigma blending (blends stay f32) ----
    h = gnn(pro, GNN1, True)
    h = gnn((1.0 - sigma) * h + sigma * tra1, GNN2, True)
    h = gnn((1.0 - sigma) * h + sigma * tra2, GNN3, True)
    h = gnn((1.0 - sigma) * h + sigma * tra3, GNN4, False)      # active=False

    # Dropout -> identity; fc + softmax(dim=1), exact f32 denominator.
    logits = dense((1.0 - sigma) * h + sigma * z, FC, 8, False)
    m = jnp.max(logits, axis=-1, keepdims=True)
    e = jnp.exp(logits - m)
    predict = e / jnp.sum(e, axis=-1, keepdims=True)

    # ---- single lane-dense unmasked writeback ----
    n_rows = pro.shape[0]
    pad = p_out - (2 * n_input + n_z + n_clusters)
    pieces = [pro, x_bar, z, predict]
    if pad > 0:
        pieces.append(jnp.zeros((n_rows, pad), f32))
    out_ref[...] = jnp.concatenate(pieces, axis=-1).astype(out_ref.dtype)


# ----------------------------- forward wrapper -------------------------------

def sdcn_forward(params, x, adj, *, sigma=0.5):
    n, v, l = x.shape
    n_input = l
    n_z = params["z_w"].shape[1]
    n_clusters = params["fc_w"].shape[1]

    total = 2 * n_input + n_z + n_clusters
    p_out = max(128, int(pl.cdiv(total, 128)) * 128)     # lane-dense packed width

    # -- conv params into one tiny SMEM vector: [w_0..w_{V-1}, bias] --
    conv = jnp.concatenate(
        [params["conv0_w"].reshape(v), params["conv0_b"].reshape(1)]
    ).astype(jnp.float32)

    # -- all 13 matmul weights -> one packed bf16 slab (one DMA, half bytes) --
    w_names = ["enc1_w", "enc2_w", "enc3_w", "z_w",
               "dec1_w", "dec2_w", "dec3_w", "xbar_w",
               "gnn1_w", "gnn2_w", "gnn3_w", "gnn4_w", "fc_w"]
    layer_dims = tuple(tuple(params[name].shape) for name in w_names)
    max_in = max(d[0] for d in layer_dims)
    max_out = max(d[1] for d in layer_dims)
    w_slab = jnp.stack([
        jnp.pad(params[name], ((0, max_in - params[name].shape[0]),
                               (0, max_out - params[name].shape[1])))
        for name in w_names
    ]).astype(jnp.bfloat16)

    # -- all 9 biases -> one packed f32 slab --
    b_names = ["enc1_b", "enc2_b", "enc3_b", "z_b",
               "dec1_b", "dec2_b", "dec3_b", "xbar_b", "fc_b"]
    max_b = max(params[name].shape[0] for name in b_names)
    b_slab = jnp.stack([
        jnp.pad(params[name], (0, max_b - params[name].shape[0]))
        for name in b_names
    ]).astype(jnp.float32)

    # -- layout-friendly casts/reshapes done once in the wrapper --
    x_vnl = jnp.transpose(x, (1, 0, 2)).astype(jnp.float32)   # (V, N, L)
    adj_bf = adj.astype(jnp.bfloat16)

    args = [conv, x_vnl, adj_bf, w_slab, b_slab]
    in_specs = [_SMEM_SPEC] + [_vmem_full(a.shape) for a in args[1:]]

    kernel = functools.partial(
        _sdcn_fused_kernel, sigma=sigma, layer_dims=layer_dims,
        n_input=n_input, n_z=n_z, n_clusters=n_clusters, p_out=p_out)

    packed = pl.pallas_call(
        kernel,
        out_shape=jax.ShapeDtypeStruct((n, p_out), jnp.float32),
        in_specs=in_specs,
        out_specs=_vmem_full((n, p_out)),
        compiler_params=pltpu.CompilerParams(
            vmem_limit_bytes=32 * 1024 * 1024),
    )(*args)

    pro_x = packed[:, 0:n_input]
    x_bar = packed[:, n_input:2 * n_input]
    z = packed[:, 2 * n_input:2 * n_input + n_z]
    predict = packed[:, 2 * n_input + n_z:2 * n_input + n_z + n_clusters]
    return x_bar, predict, z, pro_x


# ----------------------------- parameters -----------------------------------

def init_params(key, *, variable_num, n_input, n_enc_1, n_enc_2, n_enc_3,
                n_dec_1, n_dec_2, n_dec_3, n_z, n_clusters):
    def nxt():
        nonlocal key
        key, sub = jax.random.split(key)
        return sub

    def w(shape, scale=0.1):
        return scale * jax.random.normal(nxt(), shape, dtype=jnp.float32)

    def b(n):
        return 0.01 * jax.random.normal(nxt(), (n,), dtype=jnp.float32)

    params = {
        # AE (weights stored as (in, out) so y = x @ W + b)
        "conv0_w": w((1, variable_num, 1)), "conv0_b": b(1),
        "enc1_w": w((n_input, n_enc_1)),    "enc1_b": b(n_enc_1),
        "enc2_w": w((n_enc_1, n_enc_2)),    "enc2_b": b(n_enc_2),
        "enc3_w": w((n_enc_2, n_enc_3)),    "enc3_b": b(n_enc_3),
        "z_w":    w((n_enc_3, n_z)),        "z_b":   b(n_z),
        "dec1_w": w((n_z, n_dec_1)),        "dec1_b": b(n_dec_1),
        "dec2_w": w((n_dec_1, n_dec_2)),    "dec2_b": b(n_dec_2),
        "dec3_w": w((n_dec_2, n_dec_3)),    "dec3_b": b(n_dec_3),
        "xbar_w": w((n_dec_3, n_input)),    "xbar_b": b(n_input),
        # GNN layers (gnn_5 exists in __init__ but is unused in forward)
        "gnn1_w": w((n_input, n_enc_1)),
        "gnn2_w": w((n_enc_1, n_enc_2)),
        "gnn3_w": w((n_enc_2, n_enc_3)),
        "gnn4_w": w((n_enc_3, n_z)),
        "gnn5_w": w((n_z, n_clusters)),     # unused in forward (shape parity only)
        # final classifier
        "fc_w": w((n_z, n_clusters)),       "fc_b": b(n_clusters),
    }
    return params


# ----------------------------- main ------------------------------------------

if __name__ == "__main__":
    # Small, forward-consistent shapes
    N = 8            # number of samples / graph nodes
    V = 4            # variable_num (Conv1d in_channels)
    n_input = 16
    n_enc_1, n_enc_2, n_enc_3 = 32, 32, 16
    n_dec_1, n_dec_2, n_dec_3 = 16, 32, 32
    n_z = 8
    n_clusters = 4

    key = jax.random.PRNGKey(0)
    k_params, k_x, k_adj = jax.random.split(key, 3)

    params = init_params(
        k_params,
        variable_num=V, n_input=n_input,
        n_enc_1=n_enc_1, n_enc_2=n_enc_2, n_enc_3=n_enc_3,
        n_dec_1=n_dec_1, n_dec_2=n_dec_2, n_dec_3=n_dec_3,
        n_z=n_z, n_clusters=n_clusters,
    )

    x = jax.random.normal(k_x, (N, V, n_input), dtype=jnp.float32)

    # Deterministic row-normalized dense adjacency (self-loops + random edges)
    raw = (jax.random.uniform(k_adj, (N, N)) > 0.6).astype(jnp.float32)
    raw = raw + jnp.eye(N, dtype=jnp.float32)
    adj = raw / jnp.sum(raw, axis=1, keepdims=True)

    fwd = jax.jit(sdcn_forward)
    x_bar, predict, z, pro_x = fwd(params, x, adj)
    jax.block_until_ready((x_bar, predict, z, pro_x))

    assert x_bar.shape == (N, n_input)
    assert predict.shape == (N, n_clusters)
    assert z.shape == (N, n_z)
    assert pro_x.shape == (N, n_input)
    # softmax rows sum to 1 (exact f32 denominator; logits from bf16 MXU matmuls)
    assert jnp.allclose(jnp.sum(predict, axis=1), 1.0, atol=1e-3)
    assert bool(jnp.all(jnp.isfinite(x_bar))) and bool(jnp.all(jnp.isfinite(predict)))
    assert bool(jnp.all(jnp.isfinite(z))) and bool(jnp.all(jnp.isfinite(pro_x)))

    print("KERNEL_OK")
</pallas_src>

<mosaic_0001>
module attributes {stable_mosaic.version = 11 : i64} {
  func.func @_sdcn_fused_kernel(%arg0: memref<5xf32, #tpu.memory_space<smem>>, %arg1: memref<4x8x16xf32, #tpu.memory_space<vmem>>, %arg2: memref<8x8xbf16, #tpu.memory_space<vmem>>, %arg3: memref<13x32x32xbf16, #tpu.memory_space<vmem>>, %arg4: memref<9x32xf32, #tpu.memory_space<vmem>>, %arg5: memref<8x128xf32, #tpu.memory_space<vmem>>) attributes {dimension_semantics = [], scalar_prefetch = 0 : i64, scratch_operands = 0 : i64, tpu.core_type = #tpu.core_type<tc>} {
    %c4 = arith.constant 4 : index
    %0 = memref.load %arg0[%c4] : memref<5xf32, #tpu.memory_space<smem>>
    %c0 = arith.constant 0 : index
    %1 = memref.load %arg0[%c0] : memref<5xf32, #tpu.memory_space<smem>>
    %c0_0 = arith.constant 0 : index
    %c0_1 = arith.constant 0 : index
    %c0_2 = arith.constant 0 : index
    %2 = vector.load %arg1[%c0_0, %c0_1, %c0_2] : memref<4x8x16xf32, #tpu.memory_space<vmem>>, vector<1x8x16xf32>
    %3 = vector.shape_cast %2 : vector<1x8x16xf32> to vector<8x16xf32>
    %4 = vector.broadcast %1 : f32 to vector<8x16xf32>
    %5 = arith.mulf %4, %3 : vector<8x16xf32>
    %6 = vector.broadcast %0 : f32 to vector<8x16xf32>
    %7 = arith.addf %6, %5 : vector<8x16xf32>
    %c1 = arith.constant 1 : index
    %8 = memref.load %arg0[%c1] : memref<5xf32, #tpu.memory_space<smem>>
    %c1_3 = arith.constant 1 : index
    %c0_4 = arith.constant 0 : index
    %c0_5 = arith.constant 0 : index
    %9 = vector.load %arg1[%c1_3, %c0_4, %c0_5] : memref<4x8x16xf32, #tpu.memory_space<vmem>>, vector<1x8x16xf32>
    %10 = vector.shape_cast %9 : vector<1x8x16xf32> to vector<8x16xf32>
    %11 = vector.broadcast %8 : f32 to vector<8x16xf32>
    %12 = arith.mulf %11, %10 : vector<8x16xf32>
    %13 = arith.addf %7, %12 : vector<8x16xf32>
    %c2 = arith.constant 2 : index
    %14 = memref.load %arg0[%c2] : memref<5xf32, #tpu.memory_space<smem>>
    %c2_6 = arith.constant 2 : index
    %c0_7 = arith.constant 0 : index
    %c0_8 = arith.constant 0 : index
    %15 = vector.load %arg1[%c2_6, %c0_7, %c0_8] : memref<4x8x16xf32, #tpu.memory_space<vmem>>, vector<1x8x16xf32>
    %16 = vector.shape_cast %15 : vector<1x8x16xf32> to vector<8x16xf32>
    %17 = vector.broadcast %14 : f32 to vector<8x16xf32>
    %18 = arith.mulf %17, %16 : vector<8x16xf32>
    %19 = arith.addf %13, %18 : vector<8x16xf32>
    %c3 = arith.constant 3 : index
    %20 = memref.load %arg0[%c3] : memref<5xf32, #tpu.memory_space<smem>>
    %c3_9 = arith.constant 3 : index
    %c0_10 = arith.constant 0 : index
    %c0_11 = arith.constant 0 : index
    %21 = vector.load %arg1[%c3_9, %c0_10, %c0_11] : memref<4x8x16xf32, #tpu.memory_space<vmem>>, vector<1x8x16xf32>
    %22 = vector.shape_cast %21 : vector<1x8x16xf32> to vector<8x16xf32>
    %23 = vector.broadcast %20 : f32 to vector<8x16xf32>
    %24 = arith.mulf %23, %22 : vector<8x16xf32>
    %25 = arith.addf %19, %24 : vector<8x16xf32>
    %c0_12 = arith.constant 0 : index
    %c0_13 = arith.constant 0 : index
    %26 = vector.load %arg2[%c0_12, %c0_13] : memref<8x8xbf16, #tpu.memory_space<vmem>>, vector<8x8xbf16>
    %27 = arith.truncf %25 : vector<8x16xf32> to vector<8x16xbf16>
    %c0_14 = arith.constant 0 : index
    %c0_15 = arith.constant 0 : index
    %c0_16 = arith.constant 0 : index
    %28 = vector.load %arg3[%c0_14, %c0_15, %c0_16] : memref<13x32x32xbf16, #tpu.memory_space<vmem>>, vector<1x16x32xbf16>
    %29 = vector.shape_cast %28 : vector<1x16x32xbf16> to vector<16x32xbf16>
    %cst = arith.constant dense<0.000000e+00> : vector<8x32xf32>
    %30 = tpu.matmul %27, %29, %cst {dimension_numbers = #tpu.dot_dimension_numbers<[1], [0], [0], [1], [0, 0, 1, 1], [], []>} : vector<8x16xbf16>, vector<16x32xbf16>, vector<8x32xf32> -> vector<8x32xf32>
    %c0_17 = arith.constant 0 : index
    %c0_18 = arith.constant 0 : index
    %31 = vector.load %arg4[%c0_17, %c0_18] : memref<9x32xf32, #tpu.memory_space<vmem>>, vector<1x32xf32>
    %32 = vector.broadcast %31 : vector<1x32xf32> to vector<8x32xf32>
    %33 = arith.addf %30, %32 : vector<8x32xf32>
    %cst_19 = arith.constant 0.000000e+00 : f32
    %34 = vector.broadcast %cst_19 : f32 to vector<8x32xf32>
    %35 = arith.maximumf %33, %34 : vector<8x32xf32>
    %36 = arith.truncf %35 : vector<8x32xf32> to vector<8x32xbf16>
    %c1_20 = arith.constant 1 : index
    %c0_21 = arith.constant 0 : index
    %c0_22 = arith.constant 0 : index
    %37 = vector.load %arg3[%c1_20, %c0_21, %c0_22] : memref<13x32x32xbf16, #tpu.memory_space<vmem>>, vector<1x32x32xbf16>
    %38 = vector.shape_cast %37 : vector<1x32x32xbf16> to vector<32x32xbf16>
    %cst_23 = arith.constant dense<0.000000e+00> : vector<8x32xf32>
    %39 = tpu.matmul %36, %38, %cst_23 {dimension_numbers = #tpu.dot_dimension_numbers<[1], [0], [0], [1], [0, 0, 1, 1], [], []>} : vector<8x32xbf16>, vector<32x32xbf16>, vector<8x32xf32> -> vector<8x32xf32>
    %c1_24 = arith.constant 1 : index
    %c0_25 = arith.constant 0 : index
    %40 = vector.load %arg4[%c1_24, %c0_25] : memref<9x32xf32, #tpu.memory_space<vmem>>, vector<1x32xf32>
    %41 = vector.broadcast %40 : vector<1x32xf32> to vector<8x32xf32>
    %42 = arith.addf %39, %41 : vector<8x32xf32>
    %cst_26 = arith.constant 0.000000e+00 : f32
    %43 = vector.broadcast %cst_26 : f32 to vector<8x32xf32>
    %44 = arith.maximumf %42, %43 : vector<8x32xf32>
    %45 = arith.truncf %44 : vector<8x32xf32> to vector<8x32xbf16>
    %c2_27 = arith.constant 2 : index
    %c0_28 = arith.constant 0 : index
    %c0_29 = arith.constant 0 : index
    %46 = vector.load %arg3[%c2_27, %c0_28, %c0_29] : memref<13x32x32xbf16, #tpu.memory_space<vmem>>, vector<1x32x16xbf16>
    %47 = vector.shape_cast %46 : vector<1x32x16xbf16> to vector<32x16xbf16>
    %cst_30 = arith.constant dense<0.000000e+00> : vector<8x16xf32>
    %48 = tpu.matmul %45, %47, %cst_30 {dimension_numbers = #tpu.dot_dimension_numbers<[1], [0], [0], [1], [0, 0, 1, 1], [], []>} : vector<8x32xbf16>, vector<32x16xbf16>, vector<8x16xf32> -> vector<8x16xf32>
    %c2_31 = arith.constant 2 : index
    %c0_32 = arith.constant 0 : index
    %49 = vector.load %arg4[%c2_31, %c0_32] : memref<9x32xf32, #tpu.memory_space<vmem>>, vector<1x16xf32>
    %50 = vector.broadcast %49 : vector<1x16xf32> to vector<8x16xf32>
    %51 = arith.addf %48, %50 : vector<8x16xf32>
    %cst_33 = arith.constant 0.000000e+00 : f32
    %52 = vector.broadcast %cst_33 : f32 to vector<8x16xf32>
    %53 = arith.maximumf %51, %52 : vector<8x16xf32>
    %54 = arith.truncf %53 : vector<8x16xf32> to vector<8x16xbf16>
    %c3_34 = arith.constant 3 : index
    %c0_35 = arith.constant 0 : index
    %c0_36 = arith.constant 0 : index
    %55 = vector.load %arg3[%c3_34, %c0_35, %c0_36] : memref<13x32x32xbf16, #tpu.memory_space<vmem>>, vector<1x16x8xbf16>
    %56 = vector.shape_cast %55 : vector<1x16x8xbf16> to vector<16x8xbf16>
    %cst_37 = arith.constant dense<0.000000e+00> : vector<8x8xf32>
    %57 = tpu.matmul %54, %56, %cst_37 {dimension_numbers = #tpu.dot_dimension_numbers<[1], [0], [0], [1], [0, 0, 1, 1], [], []>} : vector<8x16xbf16>, vector<16x8xbf16>, vector<8x8xf32> -> vector<8x8xf32>
    %c3_38 = arith.constant 3 : index
    %c0_39 = arith.constant 0 : index
    %58 = vector.load %arg4[%c3_38, %c0_39] : memref<9x32xf32, #tpu.memory_space<vmem>>, vector<1x8xf32>
    %59 = vector.broadcast %58 : vector<1x8xf32> to vector<8x8xf32>
    %60 = arith.addf %57, %59 : vector<8x8xf32>
    %61 = arith.truncf %60 : vector<8x8xf32> to vector<8x8xbf16>
    %c4_40 = arith.constant 4 : index
    %c0_41 = arith.constant 0 : index
    %c0_42 = arith.constant 0 : index
    %62 = vector.load %arg3[%c4_40, %c0_41, %c0_42] : memref<13x32x32xbf16, #tpu.memory_space<vmem>>, vector<1x8x16xbf16>
    %63 = vector.shape_cast %62 : vector<1x8x16xbf16> to vector<8x16xbf16>
    %cst_43 = arith.constant dense<0.000000e+00> : vector<8x16xf32>
    %64 = tpu.matmul %61, %63, %cst_43 {dimension_numbers = #tpu.dot_dimension_numbers<[1], [0], [0], [1], [0, 0, 1, 1], [], []>} : vector<8x8xbf16>, vector<8x16xbf16>, vector<8x16xf32> -> vector<8x16xf32>
    %c4_44 = arith.constant 4 : index
    %c0_45 = arith.constant 0 : index
    %65 = vector.load %arg4[%c4_44, %c0_45] : memref<9x32xf32, #tpu.memory_space<vmem>>, vector<1x16xf32>
    %66 = vector.broadcast %65 : vector<1x16xf32> to vector<8x16xf32>
    %67 = arith.addf %64, %66 : vector<8x16xf32>
    %cst_46 = arith.constant 0.000000e+00 : f32
    %68 = vector.broadcast %cst_46 : f32 to vector<8x16xf32>
    %69 = arith.maximumf %67, %68 : vector<8x16xf32>
    %70 = arith.truncf %69 : vector<8x16xf32> to vector<8x16xbf16>
    %c5 = arith.constant 5 : index
    %c0_47 = arith.constant 0 : index
    %c0_48 = arith.constant 0 : index
    %71 = vector.load %arg3[%c5, %c0_47, %c0_48] : memref<13x32x32xbf16, #tpu.memory_space<vmem>>, vector<1x16x32xbf16>
    %72 = vector.shape_cast %71 : vector<1x16x32xbf16> to vector<16x32xbf16>
    %cst_49 = arith.constant dense<0.000000e+00> : vector<8x32xf32>
    %73 = tpu.matmul %70, %72, %cst_49 {dimension_numbers = #tpu.dot_dimension_numbers<[1], [0], [0], [1], [0, 0, 1, 1], [], []>} : vector<8x16xbf16>, vector<16x32xbf16>, vector<8x32xf32> -> vector<8x32xf32>
    %c5_50 = arith.constant 5 : index
    %c0_51 = arith.constant 0 : index
    %74 = vector.load %arg4[%c5_50, %c0_51] : memref<9x32xf32, #tpu.memory_space<vmem>>, vector<1x32xf32>
    %75 = vector.broadcast %74 : vector<1x32xf32> to vector<8x32xf32>
    %76 = arith.addf %73, %75 : vector<8x32xf32>
    %cst_52 = arith.constant 0.000000e+00 : f32
    %77 = vector.broadcast %cst_52 : f32 to vector<8x32xf32>
    %78 = arith.maximumf %76, %77 : vector<8x32xf32>
    %79 = arith.truncf %78 : vector<8x32xf32> to vector<8x32xbf16>
    %c6 = arith.constant 6 : index
    %c0_53 = arith.constant 0 : index
    %c0_54 = arith.constant 0 : index
    %80 = vector.load %arg3[%c6, %c0_53, %c0_54] : memref<13x32x32xbf16, #tpu.memory_space<vmem>>, vector<1x32x32xbf16>
    %81 = vector.shape_cast %80 : vector<1x32x32xbf16> to vector<32x32xbf16>
    %cst_55 = arith.constant dense<0.000000e+00> : vector<8x32xf32>
    %82 = tpu.matmul %79, %81, %cst_55 {dimension_numbers = #tpu.dot_dimension_numbers<[1], [0], [0], [1], [0, 0, 1, 1], [], []>} : vector<8x32xbf16>, vector<32x32xbf16>, vector<8x32xf32> -> vector<8x32xf32>
    %c6_56 = arith.constant 6 : index
    %c0_57 = arith.constant 0 : index
    %83 = vector.load %arg4[%c6_56, %c0_57] : memref<9x32xf32, #tpu.memory_space<vmem>>, vector<1x32xf32>
    %84 = vector.broadcast %83 : vector<1x32xf32> to vector<8x32xf32>
    %85 = arith.addf %82, %84 : vector<8x32xf32>
    %cst_58 = arith.constant 0.000000e+00 : f32
    %86 = vector.broadcast %cst_58 : f32 to vector<8x32xf32>
    %87 = arith.maximumf %85, %86 : vector<8x32xf32>
    %88 = arith.truncf %87 : vector<8x32xf32> to vector<8x32xbf16>
    %c7 = arith.constant 7 : index
    %c0_59 = arith.constant 0 : index
    %c0_60 = arith.constant 0 : index
    %89 = vector.load %arg3[%c7, %c0_59, %c0_60] : memref<13x32x32xbf16, #tpu.memory_space<vmem>>, vector<1x32x16xbf16>
    %90 = vector.shape_cast %89 : vector<1x32x16xbf16> to vector<32x16xbf16>
    %cst_61 = arith.constant dense<0.000000e+00> : vector<8x16xf32>
    %91 = tpu.matmul %88, %90, %cst_61 {dimension_numbers = #tpu.dot_dimension_numbers<[1], [0], [0], [1], [0, 0, 1, 1], [], []>} : vector<8x32xbf16>, vector<32x16xbf16>, vector<8x16xf32> -> vector<8x16xf32>
    %c7_62 = arith.constant 7 : index
    %c0_63 = arith.constant 0 : index
    %92 = vector.load %arg4[%c7_62, %c0_63] : memref<9x32xf32, #tpu.memory_space<vmem>>, vector<1x16xf32>
    %93 = vector.broadcast %92 : vector<1x16xf32> to vector<8x16xf32>
    %94 = arith.addf %91, %93 : vector<8x16xf32>
    %95 = arith.truncf %25 : vector<8x16xf32> to vector<8x16xbf16>
    %cst_64 = arith.constant dense<0.000000e+00> : vector<8x16xf32>
    %96 = tpu.matmul %26, %95, %cst_64 {dimension_numbers = #tpu.dot_dimension_numbers<[1], [0], [0], [1], [0, 0, 1, 1], [], []>} : vector<8x8xbf16>, vector<8x16xbf16>, vector<8x16xf32> -> vector<8x16xf32>
    %97 = arith.truncf %96 : vector<8x16xf32> to vector<8x16xbf16>
    %c8 = arith.constant 8 : index
    %c0_65 = arith.constant 0 : index
    %c0_66 = arith.constant 0 : index
    %98 = vector.load %arg3[%c8, %c0_65, %c0_66] : memref<13x32x32xbf16, #tpu.memory_space<vmem>>, vector<1x16x32xbf16>
    %99 = vector.shape_cast %98 : vector<1x16x32xbf16> to vector<16x32xbf16>
    %cst_67 = arith.constant dense<0.000000e+00> : vector<8x32xf32>
    %100 = tpu.matmul %97, %99, %cst_67 {dimension_numbers = #tpu.dot_dimension_numbers<[1], [0], [0], [1], [0, 0, 1, 1], [], []>} : vector<8x16xbf16>, vector<16x32xbf16>, vector<8x32xf32> -> vector<8x32xf32>
    %cst_68 = arith.constant 0.000000e+00 : f32
    %101 = vector.broadcast %cst_68 : f32 to vector<8x32xf32>
    %102 = arith.maximumf %100, %101 : vector<8x32xf32>
    %cst_69 = arith.constant 5.000000e-01 : f32
    %103 = vector.broadcast %cst_69 : f32 to vector<8x32xf32>
    %104 = arith.mulf %103, %102 : vector<8x32xf32>
    %cst_70 = arith.constant 5.000000e-01 : f32
    %105 = vector.broadcast %cst_70 : f32 to vector<8x32xf32>
    %106 = arith.mulf %105, %35 : vector<8x32xf32>
    %107 = arith.addf %104, %106 : vector<8x32xf32>
    %108 = arith.truncf %107 : vector<8x32xf32> to vector<8x32xbf16>
    %c9 = arith.constant 9 : index
    %c0_71 = arith.constant 0 : index
    %c0_72 = arith.constant 0 : index
    %109 = vector.load %arg3[%c9, %c0_71, %c0_72] : memref<13x32x32xbf16, #tpu.memory_space<vmem>>, vector<1x32x32xbf16>
    %110 = vector.shape_cast %109 : vector<1x32x32xbf16> to vector<32x32xbf16>
    %cst_73 = arith.constant dense<0.000000e+00> : vector<8x32xf32>
    %111 = tpu.matmul %108, %110, %cst_73 {dimension_numbers = #tpu.dot_dimension_numbers<[1], [0], [0], [1], [0, 0, 1, 1], [], []>} : vector<8x32xbf16>, vector<32x32xbf16>, vector<8x32xf32> -> vector<8x32xf32>
    %112 = arith.truncf %111 : vector<8x32xf32> to vector<8x32xbf16>
    %cst_74 = arith.constant dense<0.000000e+00> : vector<8x32xf32>
    %113 = tpu.matmul %26, %112, %cst_74 {dimension_numbers = #tpu.dot_dimension_numbers<[1], [0], [0], [1], [0, 0, 1, 1], [], []>} : vector<8x8xbf16>, vector<8x32xbf16>, vector<8x32xf32> -> vector<8x32xf32>
    %cst_75 = arith.constant 0.000000e+00 : f32
    %114 = vector.broadcast %cst_75 : f32 to vector<8x32xf32>
    %115 = arith.maximumf %113, %114 : vector<8x32xf32>
    %cst_76 = arith.constant 5.000000e-01 : f32
    %116 = vector.broadcast %cst_76 : f32 to vector<8x32xf32>
    %117 = arith.mulf %116, %115 : vector<8x32xf32>
    %cst_77 = arith.constant 5.000000e-01 : f32
    %118 = vector.broadcast %cst_77 : f32 to vector<8x32xf32>
    %119 = arith.mulf %118, %44 : vector<8x32xf32>
    %120 = arith.addf %117, %119 : vector<8x32xf32>
    %121 = arith.truncf %120 : vector<8x32xf32> to vector<8x32xbf16>
    %c10 = arith.constant 10 : index
    %c0_78 = arith.constant 0 : index
    %c0_79 = arith.constant 0 : index
    %122 = vector.load %arg3[%c10, %c0_78, %c0_79] : memref<13x32x32xbf16, #tpu.memory_space<vmem>>, vector<1x32x16xbf16>
    %123 = vector.shape_cast %122 : vector<1x32x16xbf16> to vector<32x16xbf16>
    %cst_80 = arith.constant dense<0.000000e+00> : vector<8x16xf32>
    %124 = tpu.matmul %121, %123, %cst_80 {dimension_numbers = #tpu.dot_dimension_numbers<[1], [0], [0], [1], [0, 0, 1, 1], [], []>} : vector<8x32xbf16>, vector<32x16xbf16>, vector<8x16xf32> -> vector<8x16xf32>
    %125 = arith.truncf %124 : vector<8x16xf32> to vector<8x16xbf16>
    %cst_81 = arith.constant dense<0.000000e+00> : vector<8x16xf32>
    %126 = tpu.matmul %26, %125, %cst_81 {dimension_numbers = #tpu.dot_dimension_numbers<[1], [0], [0], [1], [0, 0, 1, 1], [], []>} : vector<8x8xbf16>, vector<8x16xbf16>, vector<8x16xf32> -> vector<8x16xf32>
    %cst_82 = arith.constant 0.000000e+00 : f32
    %127 = vector.broadcast %cst_82 : f32 to vector<8x16xf32>
    %128 = arith.maximumf %126, %127 : vector<8x16xf32>
    %cst_83 = arith.constant 5.000000e-01 : f32
    %129 = vector.broadcast %cst_83 : f32 to vector<8x16xf32>
    %130 = arith.mulf %129, %128 : vector<8x16xf32>
    %cst_84 = arith.constant 5.000000e-01 : f32
    %131 = vector.broadcast %cst_84 : f32 to vector<8x16xf32>
    %132 = arith.mulf %131, %53 : vector<8x16xf32>
    %133 = arith.addf %130, %132 : vector<8x16xf32>
    %134 = arith.truncf %133 : vector<8x16xf32> to vector<8x16xbf16>
    %c11 = arith.constant 11 : index
    %c0_85 = arith.constant 0 : index
    %c0_86 = arith.constant 0 : index
    %135 = vector.load %arg3[%c11, %c0_85, %c0_86] : memref<13x32x32xbf16, #tpu.memory_space<vmem>>, vector<1x16x8xbf16>
    %136 = vector.shape_cast %135 : vector<1x16x8xbf16> to vector<16x8xbf16>
    %cst_87 = arith.constant dense<0.000000e+00> : vector<8x8xf32>
    %137 = tpu.matmul %134, %136, %cst_87 {dimension_numbers = #tpu.dot_dimension_numbers<[1], [0], [0], [1], [0, 0, 1, 1], [], []>} : vector<8x16xbf16>, vector<16x8xbf16>, vector<8x8xf32> -> vector<8x8xf32>
    %138 = arith.truncf %137 : vector<8x8xf32> to vector<8x8xbf16>
    %cst_88 = arith.constant dense<0.000000e+00> : vector<8x8xf32>
    %139 = tpu.matmul %26, %138, %cst_88 {dimension_numbers = #tpu.dot_dimension_numbers<[1], [0], [0], [1], [0, 0, 1, 1], [], []>} : vector<8x8xbf16>, vector<8x8xbf16>, vector<8x8xf32> -> vector<8x8xf32>
    %cst_89 = arith.constant 5.000000e-01 : f32
    %140 = vector.broadcast %cst_89 : f32 to vector<8x8xf32>
    %141 = arith.mulf %140, %139 : vector<8x8xf32>
    %cst_90 = arith.constant 5.000000e-01 : f32
    %142 = vector.broadcast %cst_90 : f32 to vector<8x8xf32>
    %143 = arith.mulf %142, %60 : vector<8x8xf32>
    %144 = arith.addf %141, %143 : vector<8x8xf32>
    %145 = arith.truncf %144 : vector<8x8xf32> to vector<8x8xbf16>
    %c12 = arith.constant 12 : index
    %c0_91 = arith.constant 0 : index
    %c0_92 = arith.constant 0 : index
    %146 = vector.load %arg3[%c12, %c0_91, %c0_92] : memref<13x32x32xbf16, #tpu.memory_space<vmem>>, vector<1x8x4xbf16>
    %147 = vector.shape_cast %146 : vector<1x8x4xbf16> to vector<8x4xbf16>
    %cst_93 = arith.constant dense<0.000000e+00> : vector<8x4xf32>
    %148 = tpu.matmul %145, %147, %cst_93 {dimension_numbers = #tpu.dot_dimension_numbers<[1], [0], [0], [1], [0, 0, 1, 1], [], []>} : vector<8x8xbf16>, vector<8x4xbf16>, vector<8x4xf32> -> vector<8x4xf32>
    %c8_94 = arith.constant 8 : index
    %c0_95 = arith.constant 0 : index
    %149 = vector.load %arg4[%c8_94, %c0_95] : memref<9x32xf32, #tpu.memory_space<vmem>>, vector<1x4xf32>
    %150 = vector.broadcast %149 : vector<1x4xf32> to vector<8x4xf32>
    %151 = arith.addf %148, %150 : vector<8x4xf32>
    %cst_96 = arith.constant dense<0xFF800000> : vector<8xf32>
    %152 = vector.multi_reduction <maximumf>, %151, %cst_96 [1] : vector<8x4xf32> to vector<8xf32>
    %153 = vector.shape_cast %152 : vector<8xf32> to vector<8x1xf32>
    %154 = vector.broadcast %153 : vector<8x1xf32> to vector<8x4xf32>
    %155 = arith.subf %151, %154 : vector<8x4xf32>
    %156 = math.exp %155 : vector<8x4xf32>
    %cst_97 = arith.constant dense<0.000000e+00> : vector<8xf32>
    %157 = vector.multi_reduction <add>, %156, %cst_97 [1] : vector<8x4xf32> to vector<8xf32>
    %158 = vector.shape_cast %157 : vector<8xf32> to vector<8x1xf32>
    %159 = vector.broadcast %158 : vector<8x1xf32> to vector<8x4xf32>
    %160 = arith.divf %156, %159 : vector<8x4xf32>
    %cst_98 = arith.constant 0.000000e+00 : f32
    %161 = vector.broadcast %cst_98 : f32 to vector<8x84xf32>
    %162 = tpu.concatenate %25, %94, %60, %160, %161 in 1 : vector<8x16xf32>, vector<8x16xf32>, vector<8x8xf32>, vector<8x4xf32>, vector<8x84xf32> -> vector<8x128xf32>
    %c0_99 = arith.constant 0 : index
    %c0_100 = arith.constant 0 : index
    %163 = vector.load %arg5[%c0_99, %c0_100] : memref<8x128xf32, #tpu.memory_space<vmem>>, vector<8x128xf32>
    tpu.vector_store %arg5[%c0_99, %c0_100], %162 {strides = array<i32>} : memref<8x128xf32, #tpu.memory_space<vmem>>, vector<8x128xf32>,
    return
  }
}

</mosaic_0001>

<bundles_post_ra>
// kernel: sdcn_forward.1
= control target key start
LH: loop header
LB: loop body
LE: loop exit
PB: predicated region body
PF: predicated region fallthrough
CT: control target
= control target key end

     0   :  { %10 = vsyncpa [#allocation3], 0  ;;  %s772_s21 = smov [#allocation2]   ;;  %s968_s0 = inlined_call_operand.vmem [shape: f32[5], index: 0, kind: input, shape index: {}]   ;;  %s969_s1 = inlined_call_operand.vmem [shape: f32[4,8,16], index: 1, kind: input, shape index: {}]   ;;  %s970_s2 = inlined_call_operand.vmem [shape: bf16[8,8], index: 2, kind: input, shape index: {}]   ;;  %s971_s3 = inlined_call_operand.vmem [shape: bf16[13,32,32], index: 3, kind: input, shape index: {}]   ;;  %s972_s4 = inlined_call_operand.vmem [shape: f32[9,32], index: 4, kind: input, shape index: {}]   ;;  %s973_s5 = inlined_call_operand.vmem [shape: f32[8,128], index: 5, kind: output, shape index: {}]  }
   0x1   :  { %s16_s20 = sshll.u32 %s968_s0, 4  ;;  %s17_s20 = int_to_ptr.vmem [resolvable:$true] %s16_s20 }
   0x2   :  { %19 = dma.vmem_to_smem %s17_s20, 16, %s772_s21, [#allocation3]  }
   0x3   :  { %770 = dma.done.wait [#allocation3], 16  }
   0x4   :  { %771 = vsyncadd [#allocation3], 4294967280 }
   0x5   :  { %32 = sfence }
   0x6   :  { %v724_v0 = vld [vmem:[%s971_s3] sm:$0xff]  ;;  %s598_s24 = sld [smem:[#allocation2 + $0x4]]  ;;  %v600_v2 = vld [vmem:[%s969_s1 + $0x8] sm:$0xff]  ;;  %v602_v5 = vld [vmem:[%s969_s1 + $0x10] sm:$0xff]  ;;  %vm71_vm0 = vcmask 130048   ;;  %vm109_vm1 = vcmask 261120  }
   0x7   :  { %s35_s25 = sld [smem:[#allocation2]]  ;;  %82 = vmatpush.bf16.msra.mxu0 %v724_v0  ;;  %v36_v1 = vld [vmem:[%s969_s1] sm:$0xff]  ;;  %v604_v10 = vld [vmem:[%s969_s1 + $0x18] sm:$0xff]  ;;  %v725_v20 = vld [vmem:[%s971_s3 + $0x10] sm:$0xff]  ;;  %vm201_vm2 = vcmask 1043456   ;;  %vm197_vm3 = vcmask 64512  }
   0x8   :  { %s599_s26 = sld [smem:[#allocation2 + $0x1]]  ;;  %v726_v19 = vld [vmem:[%s971_s3 + $0x18] sm:$0xff]  ;;  %v745_v21 = vld [vmem:[%s972_s4] ss:$0 sm:$0xff]  ;;  %v728_v27 = vld [vmem:[%s971_s3 + $0x28] sm:$0xff]  ;;  %s773_s6 = smov 16  }
   0x9   :  { %s601_s29 = sld [smem:[#allocation2 + $0x2]]  ;;  %119 = vmatpush.bf16.msra.mxu1 %v726_v19  ;;  %156 = vmatpush.bf16.msra.mxu2 %v728_v27  ;;  %v727_v28 = vld [vmem:[%s971_s3 + $0x20] sm:$0xff]  ;;  %v729_v35 = vld [vmem:[%s971_s3 + $0x30] sm:$0xff]  ;;  %v732_v62 = vld [vmem:[%s971_s3 + $0x68] sm:$0xff]  ;;  %s774_s7 = smov 32   ;;  %vm549_vm4 = vcmask 31744  }
   0xa   :  { %s603_s0 = sld [smem:[#allocation2 + $0x3]]  ;;  %v746_v29 = vld [vmem:[%s972_s4 + $0x1] ss:$0 sm:$0xff]  ;;  %186 = vmatpush.bf16.msra.mxu3 %v729_v35  ;;  %v747_v36 = vld [vmem:[%s972_s4 + $0x2] ss:$0 sm:$0xff]  ;;  %v730_v51 = vld [vmem:[%s971_s3 + $0x50] sm:$0xff] }
   0xb   :  { %v643_v42 = vld [vmem:[%s971_s3 + $0x40] sm:$0xf]  ;;  %v749_v53 = vld [vmem:[%s972_s4 + $0x4] ss:$0 sm:$0xff]  ;;  %v737_v0 = vld [vmem:[%s971_s3 + $0x98] sm:$0xff]  ;;  %vm588_vm9 = vcmask 326656  }
   0xc   :  { %v39_v4 = vstv %s598_s24  ;;  %v203_v43 = vsel %vm201_vm2, %v643_v42, 0  ;;  %v748_v45 = vld [vmem:[%s972_s4 + $0x3] ss:$0 sm:$0xff]  ;;  %vm590_vm10 = vcmask 359424  }
   0xd   :  { %v37_v3 = vstv %s35_s25  ;;  %120 = vmatpush.bf16.msra.mxu1 %v725_v20  ;;  %157 = vmatpush.bf16.msra.mxu2 %v727_v28  ;;  %v884_v50 = vld [vmem:[%s970_s2] sm:$0xf]  ;;  %v739_v28 = vld [vmem:[%s971_s3 + $0xa8] sm:$0xff] }
   0xe   :  { %v38_v6 = vmul.f32 %v37_v3, %v36_v1  ;;  %v44_v7 = vstv %s599_s26  ;;  %212 = vmatpush.bf16.msrb.mxu0 %v203_v43  ;;  %241 = vmatpush.bf16.msrb.mxu3 %v730_v51  ;;  %v735_v52 = vld [vmem:[%s971_s3 + $0x80] sm:$0xff]  ;;  %v736_v1 = vld [vmem:[%s971_s3 + $0x90] sm:$0xff] }
   0xf   :  { %v45_v8 = vmul.f32 %v600_v2, %v44_v7  ;;  %v50_v9 = vstv %s601_s29  ;;  %v731_v63 = vld [vmem:[%s971_s3 + $0x60] sm:$0xff] }
  0x10   :  { %v40_v11 = vadd.f32 %v39_v4, %v38_v6  ;;  %v51_v12 = vmul.f32 %v602_v5, %v50_v9  ;;  %v56_v13 = vstv %s603_s0  ;;  %v750_v2 = vld [vmem:[%s972_s4 + $0x5] ss:$0 sm:$0xff] }
  0x11   :  { %v57_v15 = vmul.f32 %v604_v10, %v56_v13  ;;  %277 = vmatpush.bf16.msrb.mxu1 %v732_v62 }
  0x12   :  { %v46_v14 = vadd.f32 %v45_v8, %v40_v11 }
  0x14   :  { %v52_v16 = vadd.f32 %v51_v12, %v46_v14 }
  0x15   :  { %278 = vmatpush.bf16.msrb.mxu1 %v731_v63 }
  0x16   :  { %v824_v17 = vadd.f32 %v57_v15, %v52_v16  ;;  %v734_v15 = vld [vmem:[%s971_s3 + $0x78] sm:$0xff]  ;;  %v733_v16 = vld [vmem:[%s971_s3 + $0x70] sm:$0xff] }
  0x17   :  { %314 = vmatpush.bf16.msrb.mxu2 %v734_v15 }
  0x18   :  { %v60_v18 = vpack.c.bf16 %v824_v17, %v824_v17 }
  0x1a   :  { %609 = vmatmul.msk.bf16.vlgmr.msra.gmra.mxu0 %vm71_vm0, %v60_v18  ;;  %v324_v44 = vsel %vm201_vm2, %v60_v18, 0  ;;  %v751_v18 = vld [vmem:[%s972_s4 + $0x6] ss:$0 sm:$0xff] }
  0x1b   :  { %333 = vmatpush.bf16.msra.mxu0 %v324_v44  ;;  %315 = vmatpush.bf16.msrb.mxu2 %v733_v16 }
  0x97   :  { %v84_v22 = vpop.f32.mrf.mxu0 }
  0x98   :  { %v85_v23 = vadd.f32 %v745_v21, %v84_v22 }
  0x9a   :  { %v838_v24 = vmax.f32 %v85_v23, 0.0 }
  0x9c   :  { %v89_v25 = vpack.c.bf16 %v838_v24, %v838_v24  ;;  %v367_v10 = vmul.f32 0.5, %v838_v24 }
  0x9e   :  { %622 = vmatmul.msk.bf16.vlgmr.msra.gmra.mxu1 %vm109_vm1, %v89_v25 }
  0x9f   :  { %v86_v26 = vpop.f32.mrf.mxu0  ;;  %396 = vmatpush.bf16.msra.mxu1 %v737_v0 }
  0xa3   :  { %397 = vmatpush.bf16.msra.mxu1 %v736_v1 }
 0x11b   :  { %v122_v30 = vpop.f32.mrf.mxu1 }
 0x11c   :  { %v123_v31 = vadd.f32 %v746_v29, %v122_v30  ;;  %v738_v29 = vld [vmem:[%s971_s3 + $0xa0] sm:$0xff] }
 0x11d   :  { %v752_v30 = vld [vmem:[%s972_s4 + $0x7] ss:$0 sm:$0xff] }
 0x11e   :  { %v852_v32 = vmax.f32 %v123_v31, 0.0 }
 0x120   :  { %v127_v33 = vpack.c.bf16 %v852_v32, %v852_v32 }
 0x122   :  { %635 = vmatmul.msk.bf16.vlgmr.msra.gmra.mxu2 %vm109_vm1, %v127_v33 }
 0x123   :  { %v124_v34 = vpop.f32.mrf.mxu1 }
 0x1a5   :  { %v159_v37 = vpop.f32.mrf.mxu2 }
 0x1a6   :  { %v160_v38 = vadd.f32 %v747_v36, %v159_v37  ;;  %v422_v37 = vmul.f32 0.5, %v852_v32 }
 0x1a8   :  { %v863_v39 = vmax.f32 %v160_v38, 0.0 }
 0x1aa   :  { %v164_v40 = vpack.c.bf16 %v863_v39, %v863_v39  ;;  %v477_v51 = vmul.f32 0.5, %v863_v39 }
 0x1ac   :  { %642 = vmatmul.msk.bf16.vlgmr.msra.gmra.mxu3 %vm71_vm0, %v164_v40 }
 0x1ad   :  { %v161_v41 = vpop.f32.mrf.mxu2  ;;  %359 = vmatpush.bf16.msra.mxu3 %v735_v52 }
 0x22f   :  { %v188_v46 = vpop.f32.mrf.mxu3 }
 0x230   :  { %v876_v47 = vadd.f32 %v748_v45, %v188_v46 }
 0x232   :  { %v192_v48 = vpack.c.bf16 %v876_v47, %v876_v47  ;;  %v523_v63 = vmul.f32 0.5, %v876_v47 }
 0x234   :  { %644 = vmatmul.msk.bf16.vlgmr.msrb.gmra.mxu0 %vm197_vm3, %v192_v48  ;;  %v740_v48 = vld [vmem:[%s971_s3 + $0xb0] sm:$0xff] }
 0x235   :  { %451 = vmatpush.bf16.msrb.mxu0 %v739_v28 }
 0x237   :  { %v190_v49 = vpop.f32.mrf.mxu3 }
 0x239   :  { %452 = vmatpush.bf16.msrb.mxu0 %v738_v29 }
 0x244   :  { %678 = vmatmul.msk.bf16.vlgmr.msra.gmra.mxu0 %vm197_vm3, %v884_v50 }
 0x2b1   :  { %v214_v54 = vpop.f32.mrf.mxu0 }
 0x2b2   :  { %v215_v55 = vadd.f32 %v749_v53, %v214_v54 }
 0x2b4   :  { %v218_v56 = vmax.f32 %v215_v55, 0.0 }
 0x2b6   :  { %v219_v57 = vpack.c.bf16 %v218_v56, %v218_v56 }
 0x2b8   :  { %651 = vmatmul.msk.bf16.vlgmr.msrb.gmra.mxu3 %vm71_vm0, %v219_v57 }
 0x2b9   :  { %v216_v58 = vpop.f32.mrf.mxu0 }
 0x2c1   :  { %v335_v59 = vpop.f32.mrf.mxu0 }
 0x2c2   :  { %v339_v60 = vpack.c.bf16 %v335_v59, %v335_v59 }
 0x2c8   :  { %685 = vmatmul.msk.bf16.vlgmr.msra.gmra.mxu3 %vm71_vm0, %v339_v60  ;;  %v722_v60 = vld [vmem:[%s971_s3 + $0xc0] sm:$0xf]  ;;  %s775_s3 = smov 40  }
 0x2c9   :  { %v337_v61 = vpop.f32.mrf.mxu0  ;;  %v534_v39 = vsel %vm201_vm2, %v722_v60, 0 }
 0x2ca   :  { %543 = vmatpush.bf16.msra.mxu0 %v534_v39 }
 0x33b   :  { %v243_v3 = vpop.f32.mrf.mxu3 }
 0x33c   :  { %v244_v4 = vadd.f32 %v750_v2, %v243_v3 }
 0x33e   :  { %v247_v5 = vmax.f32 %v244_v4, 0.0 }
 0x340   :  { %v248_v6 = vpack.c.bf16 %v247_v5, %v247_v5 }
 0x342   :  { %664 = vmatmul.msk.bf16.vlgmr.msrb.gmra.mxu1 %vm109_vm1, %v248_v6 }
 0x343   :  { %v245_v7 = vpop.f32.mrf.mxu3  ;;  %499 = vmatpush.bf16.msrb.mxu1 %v740_v48 }
 0x34b   :  { %v361_v8 = vpop.f32.mrf.mxu3 }
 0x34c   :  { %v365_v9 = vmax.f32 %v361_v8, 0.0 }
 0x34e   :  { %v366_v11 = vmul.f32 0.5, %v365_v9 }
 0x350   :  { %v368_v12 = vadd.f32 %v367_v10, %v366_v11 }
 0x352   :  { %v369_v13 = vpack.c.bf16 %v368_v12, %v368_v12 }
 0x353   :  { %v363_v14 = vpop.f32.mrf.mxu3 }
 0x354   :  { %698 = vmatmul.msk.bf16.vlgmr.msra.gmra.mxu1 %vm109_vm1, %v369_v13 }
 0x3bf   :  { %v280_v19 = vpop.f32.mrf.mxu1 }
 0x3c0   :  { %v281_v20 = vadd.f32 %v751_v18, %v280_v19 }
 0x3c2   :  { %v284_v21 = vmax.f32 %v281_v20, 0.0 }
 0x3c4   :  { %v285_v22 = vpack.c.bf16 %v284_v21, %v284_v21 }
 0x3c6   :  { %677 = vmatmul.msk.bf16.vlgmr.msrb.gmra.mxu2 %vm109_vm1, %v285_v22 }
 0x3c7   :  { %v282_v23 = vpop.f32.mrf.mxu1 }
 0x3d1   :  { %v399_v24 = vpop.f32.mrf.mxu1 }
 0x3d2   :  { %v403_v25 = vpack.c.bf16 %v399_v24, %v399_v24 }
 0x3d4   :  { %v405_v26 = vsel %vm201_vm2, %v403_v25, 0 }
 0x3d5   :  { %414 = vmatpush.bf16.msra.mxu2 %v405_v26 }
 0x3d8   :  { %699 = vmatmul.msk.bf16.vlgmr.msra.gmra.mxu2 %vm197_vm3, %v884_v50 }
 0x3d9   :  { %v401_v27 = vpop.f32.mrf.mxu1 }
 0x449   :  { %v317_v31 = vpop.f32.mrf.mxu2 }
 0x44a   :  { %v318_v33 = vadd.f32 %v752_v30, %v317_v31 }
 0x44c   :  { %575 = vrot.lane.b32.xlu1 %v318_v33, %s773_s6 }
 0x451   :  { %v319_v34 = vpop.f32.mrf.mxu2 }
 0x454   :  { %579 = vrot.lane.b32.xlu1 %v876_v47, %s774_s7 }
 0x45b   :  { %v416_v35 = vpop.f32.mrf.mxu2 }
 0x45c   :  { %v420_v36 = vmax.f32 %v416_v35, 0.0 }
 0x45e   :  { %v421_v38 = vmul.f32 0.5, %v420_v36 }
 0x460   :  { %v423_v40 = vadd.f32 %v422_v37, %v421_v38 }
 0x462   :  { %v424_v41 = vpack.c.bf16 %v423_v40, %v423_v40 }
 0x463   :  { %v418_v42 = vpop.f32.mrf.mxu2 }
 0x464   :  { %712 = vmatmul.msk.bf16.vlgmr.msrb.gmra.mxu0 %vm109_vm1, %v424_v41 }
 0x4be   :  { %v576_v24 = vpop.permute.xlu1 %575 }
 0x4bf   :  { %v586_v26 = vsel %vm71_vm0, %v824_v17, %v576_v24 }
 0x4c6   :  { %v580_v25 = vpop.permute.xlu1 %579 }
 0x4c7   :  { %v587_v27 = vsel %vm109_vm1, %v586_v26, %v580_v25 }
 0x4e1   :  { %v454_v43 = vpop.f32.mrf.mxu0 }
 0x4e2   :  { %v458_v44 = vpack.c.bf16 %v454_v43, %v454_v43 }
 0x4e4   :  { %v460_v45 = vsel %vm201_vm2, %v458_v44, 0 }
 0x4e5   :  { %469 = vmatpush.bf16.msrb.mxu3 %v460_v45 }
 0x4e8   :  { %713 = vmatmul.msk.bf16.vlgmr.msrb.gmra.mxu3 %vm197_vm3, %v884_v50 }
 0x4e9   :  { %v456_v46 = vpop.f32.mrf.mxu0 }
 0x56b   :  { %v471_v32 = vpop.f32.mrf.mxu3 }
 0x56c   :  { %v475_v49 = vmax.f32 %v471_v32, 0.0 }
 0x56e   :  { %v476_v52 = vmul.f32 0.5, %v475_v49 }
 0x570   :  { %v478_v53 = vadd.f32 %v477_v51, %v476_v52 }
 0x572   :  { %v479_v54 = vpack.c.bf16 %v478_v53, %v478_v53 }
 0x573   :  { %v473_v55 = vpop.f32.mrf.mxu3 }
 0x574   :  { %720 = vmatmul.msk.bf16.vlgmr.msrb.gmra.mxu1 %vm71_vm0, %v479_v54 }
 0x5f1   :  { %v501_v56 = vpop.f32.mrf.mxu1 }
 0x5f2   :  { %v505_v57 = vpack.c.bf16 %v501_v56, %v501_v56 }
 0x5f4   :  { %v507_v58 = vsel %vm201_vm2, %v505_v57, 0 }
 0x5f5   :  { %516 = vmatpush.bf16.msrb.mxu2 %v507_v58 }
 0x5f8   :  { %721 = vmatmul.msk.bf16.vlgmr.msrb.gmra.mxu2 %vm197_vm3, %v884_v50  ;;  %v753_v50 = vld [vmem:[%s972_s4 + $0x8] ss:$0 sm:$0xff] }
 0x5f9   :  { %v503_v59 = vpop.f32.mrf.mxu1 }
 0x67b   :  { %v518_v61 = vpop.f32.mrf.mxu2 }
 0x67c   :  { %v522_v62 = vmul.f32 0.5, %v518_v61 }
 0x67e   :  { %v524_v0 = vadd.f32 %v523_v63, %v522_v62 }
 0x680   :  { %v525_v1 = vpack.c.bf16 %v524_v0, %v524_v0 }
 0x682   :  { %723 = vmatmul.msk.bf16.vlgmr.msra.gmra.mxu0 %vm197_vm3, %v525_v1 }
 0x683   :  { %v520_v2 = vpop.f32.mrf.mxu2 }
 0x6ff   :  { %v545_v3 = vpop.f32.mrf.mxu0 }
 0x700   :  { %v546_v4 = vadd.f32 %v753_v50, %v545_v3 }
 0x702   :  { %v550_v5 = vsel %vm549_vm4, %v546_v4, -inf }
 0x703   :  { %551 = vmax.xlane.f32.xlu0 %v550_v5 }
 0x707   :  { %v547_v6 = vpop.f32.mrf.mxu0 }
 0x776   :  { %v552_v7 = vpop.xlane.xlu0 %551 }
 0x777   :  { %v553_v8 = vsub.f32 %v546_v4, %v552_v7 }
 0x779   :  { %v554_v9 = vmul.f32 1.442695, %v553_v8 }
 0x77b   :  { %754 = vpow2.f32 %v554_v9 }
 0x781   :  { %v755_v47 = vpop.eup %754 }
 0x782   :  { %v556_v10 = vsel %vm549_vm4, %v755_v47, 0.0 }
 0x783   :  { %557 = vadd.xlane.f32.xlu0 %v556_v10 }
 0x7f6   :  { %v558_v11 = vpop.xlane.xlu0 %557 }
 0x7f7   :  { %756 = vrcp.f32 %v558_v11  ;;  %v570_v15 = vand.u32 2147483648, %v558_v11  ;;  %v568_v18 = vand.u32 2147483647, %v558_v11  ;;  %vm564_vm6 = vweird.f32 %v558_v11 }
 0x7f9   :  { %v571_v20 = vor.u32 1.1754944e-38, %v570_v15  ;;  %vm569_vm8 = vcmp.eq.f32.partialorder %v568_v18, 8.507059e+37 }
 0x7fd   :  { %v757_v12 = vpop.eup %756 }
 0x7fe   :  { %v560_v13 = vmul.f32 %v757_v12, %v558_v11  ;;  %vm565_vm5 = vweird.f32 %v757_v12 }
 0x7ff   :  { %vm566_vm7 = vmor %vm564_vm6, %vm565_vm5 }
 0x800   :  { %v561_v14 = vsub.f32 1.0, %v560_v13 }
 0x802   :  { %v562_v16 = vmul.f32 %v757_v12, %v561_v14 }
 0x804   :  { %v563_v19 = vadd.f32 %v757_v12, %v562_v16 }
 0x806   :  { %v567_v21 = vsel %vm566_vm7, %v757_v12, %v563_v19 }
 0x807   :  { %v572_v22 = vsel %vm569_vm8, %v571_v20, %v567_v21 }
 0x808   :  { %v573_v23 = vmul.f32 %v755_v47, %v572_v22 }
 0x80a   :  { %583 = vrot.lane.b32.xlu2 %v573_v23, %s775_s3 }
 0x864   :  { %v584_v28 = vpop.permute.xlu2 %583 }
 0x865   :  { %v589_v29 = vsel %vm588_vm9, %v587_v27, %v584_v28 }
 0x866   :  { %v591_v30 = vsel %vm590_vm10, %v589_v29, 0.0 }
 0x867   :  { %592 = vst [vmem:[%s973_s5] sm:$0xff] %v591_v30 }
 0x868   :  { %597 = vsyncpa [#allocation3], 1 }

</bundles_post_ra>
